<compile_context>
chip_gen: v6e
topology: v6e:2x2x1
jax: 0.10.0
libtpu: 0.0.40
codegen_flags: <defaults>
</compile_context>

<pallas_src>
import functools

import jax
import jax.numpy as jnp
from jax.experimental import pallas as pl
from jax.experimental.pallas import tpu as pltpu


_LANE = 1024                      # 8 sublanes x 128 lanes -> unmasked full vst
_BLOCK_BYTES = 8 * 1024 * 1024    # ~8 MiB per buffer (perf review, v7x)
_VMEM_LIMIT = 40 << 20            # 2 operands x 2 buffers x 8 MiB + headroom


# ----------------------------------------------------------------------------
# Kernel: lane-dense tiled copy
# ----------------------------------------------------------------------------
def _copy_kernel(x_ref, o_ref):
    # x_ref / o_ref: (block_rows, _LANE) VMEM tiles; _LANE is a multiple of
    # 128 so the store is a full, unmasked vst.
    o_ref[...] = x_ref[...]


# ----------------------------------------------------------------------------
# Wrapper: View(size)
# ----------------------------------------------------------------------------
def _resolve_size(total, size):
    size = tuple(int(s) for s in size)
    if size.count(-1) > 1:
        raise ValueError("only one dimension may be -1")
    if -1 in size:
        known = 1
        for s in size:
            if s != -1:
                known *= s
        size = tuple(total // known if s == -1 else s for s in size)
    prod = 1
    for s in size:
        prod *= s
    if prod != total:
        raise ValueError(f"cannot view {total} elements as {size}")
    return size


@functools.partial(jax.jit, static_argnames=("size",))
def view(x, size):
    """Pallas equivalent of `x.view(size)` for contiguous tensors."""
    total = x.size
    out_size = _resolve_size(total, size)

    # Metadata-only path (perf review #1): for non-lane-aligned totals the
    # old pad+copy+slice path cost ~4x tensor bytes in HBM traffic for an op
    # XLA treats as free, so just reinterpret the shape.
    if total == 0 or total % _LANE != 0:
        return jnp.reshape(x, out_size)

    rows = total // _LANE
    itemsize = jnp.dtype(x.dtype).itemsize

    # ~8 MiB per buffer; tiny inputs collapse to a single grid step.
    max_rows = max(8, _BLOCK_BYTES // (_LANE * itemsize))
    block_rows = min(rows, max_rows)
    grid = (pl.cdiv(rows, block_rows),)

    arr2d = x.reshape(rows, _LANE)          # metadata-only re-presentation

    out2d = pl.pallas_call(
        _copy_kernel,
        out_shape=jax.ShapeDtypeStruct((rows, _LANE), x.dtype),
        grid=grid,
        in_specs=[pl.BlockSpec((block_rows, _LANE), lambda i: (i, 0))],
        out_specs=pl.BlockSpec((block_rows, _LANE), lambda i: (i, 0)),
        compiler_params=pltpu.CompilerParams(
            dimension_semantics=("parallel",),
            vmem_limit_bytes=_VMEM_LIMIT),
        cost_estimate=pl.CostEstimate(
            flops=0, transcendentals=0,
            bytes_accessed=2 * total * itemsize),
    )(arr2d)

    # Final reshape is metadata-only (matches torch.Tensor.view).
    return out2d.reshape(out_size)


# ----------------------------------------------------------------------------
# Demo / verification
# ----------------------------------------------------------------------------
if __name__ == "__main__":
    key = jax.random.PRNGKey(0)
    x = jax.random.normal(key, (2, 4, 16, 16), dtype=jnp.float32)  # 2048 elems

    # View((2, -1)): (2, 4, 16, 16) -> (2, 1024)   (Pallas copy path)
    y1 = jax.block_until_ready(view(x, size=(2, -1)))
    assert y1.shape == (2, 1024)
    assert jnp.array_equal(y1, jnp.reshape(x, (2, 1024)))

    # View((-1, 256)): (2, 4, 16, 16) -> (8, 256)  (Pallas copy path)
    y2 = jax.block_until_ready(view(x, size=(-1, 256)))
    assert y2.shape == (8, 256)
    assert jnp.array_equal(y2, jnp.reshape(x, (8, 256)))

    # Non-lane-aligned total: metadata-only reshape path (no pad/slice).
    x3 = jax.random.normal(key, (3, 5, 7), dtype=jnp.float32)      # 105 elems
    y3 = jax.block_until_ready(view(x3, size=(-1,)))
    assert y3.shape == (105,)
    assert jnp.array_equal(y3, jnp.reshape(x3, (105,)))

    print("KERNEL_OK")
</pallas_src>

<mosaic_0001>
module attributes {stable_mosaic.version = 11 : i64} {
  func.func @_copy_kernel(%arg0: i32, %arg1: memref<2x1024xf32, #tpu.memory_space<vmem>>, %arg2: memref<2x1024xf32, #tpu.memory_space<vmem>>) attributes {dimension_semantics = [#tpu.dimension_semantics<parallel>], iteration_bounds = array<i64: 1>, scalar_prefetch = 0 : i64, scratch_operands = 0 : i64, tpu.core_type = #tpu.core_type<tc>, window_params = [{transform_indices = @transform_0, window_bounds = array<i64: 2, 1024>}, {transform_indices = @transform_1, window_bounds = array<i64: 2, 1024>}]} {
    %c0 = arith.constant 0 : index
    %c0_0 = arith.constant 0 : index
    %0 = vector.load %arg1[%c0, %c0_0] : memref<2x1024xf32, #tpu.memory_space<vmem>>, vector<2x1024xf32>
    %c0_1 = arith.constant 0 : index
    %c0_2 = arith.constant 0 : index
    %1 = vector.load %arg2[%c0_1, %c0_2] : memref<2x1024xf32, #tpu.memory_space<vmem>>, vector<2x1024xf32>
    tpu.vector_store %arg2[%c0_1, %c0_2], %0 {strides = array<i32>} : memref<2x1024xf32, #tpu.memory_space<vmem>>, vector<2x1024xf32>,
    return
  }
  func.func @transform_0(%arg0: i32) -> (i32, i32) {
    %c0_i32 = arith.constant 0 : i32
    %c0_i32_0 = arith.constant 0 : i32
    return %arg0, %c0_i32 : i32, i32
  }
  func.func @transform_1(%arg0: i32) -> (i32, i32) {
    %c0_i32 = arith.constant 0 : i32
    %c0_i32_0 = arith.constant 0 : i32
    return %arg0, %c0_i32 : i32, i32
  }
}

</mosaic_0001>

<bundles_post_ra>
// kernel: view.1
= control target key start
LH: loop header
LB: loop body
LE: loop exit
PB: predicated region body
PF: predicated region fallthrough
CT: control target
= control target key end

     0   :  { %s70_s0 = inlined_call_operand.vmem [shape: f32[2,1024], index: 0, kind: input, shape index: {}]   ;;  %s71_s1 = inlined_call_operand.hbm [shape: f32[2,1024], index: 1, kind: output, shape index: {}]  }
   0x1   :  { %v9_v0 = vld [vmem:[%s70_s0] sm:$0xff]  ;;  %v10_v1 = vld [vmem:[%s70_s0 + $0x8] sm:$0xff] }
   0x2   :  { %6 = vsyncpa [#allocation3], 0  ;;  %11 = vst [vmem:[#allocation2] sm:$0xff] %v9_v0  ;;  %s50_s10 = smov [#allocation2]  }
   0x3   :  { %12 = vst [vmem:[#allocation2 + $0x8] sm:$0xff] %v10_v1  ;;  %s19_s11 = sshll.u32 %s50_s10, 4  ;;  %s20_s11 = int_to_ptr.vmem [resolvable:$true] %s19_s11 }
   0x4   :  { %s28_s12 = scalar_lea.vmem %s20_s11, 256  ;;  %p33_p1 = scmp.lt.s32.totalorder %s20_s11, %s20_s11 }
   0x5   :  { %p29_p0 = scmp.ne.s32.totalorder %s20_s11, %s28_s12  ;;  %p34_p2 = scmp.lt.s32.totalorder %s28_s12, %s28_s12 }
   0x7   :  { %p35_p3 = por %p34_p2, %p33_p1 }
   0x9   :  { %p36_p4 = pnand %p35_p3, %p29_p0 }
   0xb   :  { %39 = shalt.err (!%p36_p4)
}
   0xc   :  { %22 = dma.vmem_to_hbm [thread:$0]  %s20_s11, 256, %s71_s1, [#allocation3]  }
   0xd   :  { %48 = dma.done.wait [#allocation3], 256  }
   0xe   :  { %49 = vsyncadd [#allocation3], 4294967040 }
   0xf   :  { %26 = vsyncpa [#allocation3], 1 }

</bundles_post_ra>
